<compile_context>
chip_gen: v7x
topology: tpu7x:2x2x1
jax: 0.10.0
libtpu: 0.0.40
codegen_flags: <defaults>
</compile_context>

<pallas_src>
import jax
import jax.numpy as jnp
from jax.experimental import pallas as pl
from jax.experimental.pallas import tpu as pltpu

IN_FEATURES = 784
OUT_FEATURES = 10
MAX_BATCH_TILE = 1024   # 1024*784*4B ~= 3.1 MiB per x buffer (x2 double-buffered)


def _mlp_kernel(x_ref, w1_ref, b1_ref, w2_ref, b2_ref, w3_ref, b3_ref, o_ref):
    # Fused 3-layer MLP on one batch tile. All weights are tiny and stay
    # resident in VMEM; the only grid axis is batch.
    x = x_ref[...].astype(jnp.float32)                                   # (Bt, 784)

    h1 = jnp.dot(x, w1_ref[...], preferred_element_type=jnp.float32) + b1_ref[...]
    h1 = jnp.maximum(h1, 0.0)                                            # ReLU

    h2 = jnp.dot(h1, w2_ref[...], preferred_element_type=jnp.float32) + b2_ref[...]
    h2 = jnp.maximum(h2, 0.0)                                            # ReLU

    out = jnp.dot(h2, w3_ref[...], preferred_element_type=jnp.float32) + b3_ref[...]
    o_ref[...] = out.astype(o_ref.dtype)                                 # (Bt, 10)


def _batch_tile(batch: int) -> int:
    """Sublane-aligned batch tile, capped at MAX_BATCH_TILE.

    For batches that fit in <= 2 max tiles we split them in half (rounded up to
    a multiple of 8) so the grid has >=2 'parallel' steps whenever possible,
    letting v7x shard the batch across both TensorCores."""
    half = (batch + 1) // 2
    bt = ((half + 7) // 8) * 8
    return max(8, min(MAX_BATCH_TILE, bt))


@jax.jit
def net_forward(x, w1, b1, w2, b2, w3, b3):
    """Forward pass matching Net.forward.

    x: (B, 1, 28, 28) float32 (NCHW, like PyTorch) or already (B, 784)
    w_i: (in, out) float32 (transposed vs. PyTorch's (out, in) state_dict!)
    b_i: (1, out) float32
    returns: (B, 10) float32 logits
    """
    B = x.shape[0]
    x2d = x.reshape(B, -1)                          # == input.view(B, -1)
    assert x2d.shape[1] == IN_FEATURES, f"expected {IN_FEATURES} features"

    bt = _batch_tile(B)
    grid = (pl.cdiv(B, bt),)                        # ragged last block is masked
                                                    # by Pallas; no jnp.pad copy.

    full = lambda arr: pl.BlockSpec(arr.shape, lambda i: (0, 0))

    out = pl.pallas_call(
        _mlp_kernel,
        out_shape=jax.ShapeDtypeStruct((B, OUT_FEATURES), jnp.float32),
        grid_spec=pltpu.PrefetchScalarGridSpec(
            num_scalar_prefetch=0,
            grid=grid,
            in_specs=[
                pl.BlockSpec((bt, IN_FEATURES), lambda i: (i, 0)),   # x tile
                full(w1), full(b1),
                full(w2), full(b2),
                full(w3), full(b3),
            ],
            # Block last dim (10) equals the full array dim -> legal block;
            # writeback to HBM is contiguous since the block spans full width.
            out_specs=pl.BlockSpec((bt, OUT_FEATURES), lambda i: (i, 0)),
        ),
        # ~6.5 MiB of VMEM at bt=1024 -> well under every generation's default
        # scoped-VMEM limit, so no vmem_limit_bytes override is needed.
        compiler_params=pltpu.CompilerParams(
            dimension_semantics=("parallel",),
        ),
    )(x2d, w1, b1, w2, b2, w3, b3)

    return out


def init_params(key):
    """Deterministic init mimicking nn.Linear defaults (uniform +-1/sqrt(fan_in)).

    Weights are stored as (in, out) so the kernel does x @ W (equivalent to
    PyTorch's x @ W.T with W of shape (out, in))."""
    dims = [(784, 8), (8, 8), (8, 10)]
    params = []
    for (fan_in, fan_out) in dims:
        key, kw, kb = jax.random.split(key, 3)
        bound = 1.0 / jnp.sqrt(fan_in)
        w = jax.random.uniform(kw, (fan_in, fan_out), jnp.float32, -bound, bound)
        b = jax.random.uniform(kb, (1, fan_out), jnp.float32, -bound, bound)
        params.extend([w, b])
    return params


def reference_forward(x, w1, b1, w2, b2, w3, b3):
    """Plain-JAX reference for sanity checking."""
    h = x.reshape(x.shape[0], -1)
    h = jnp.maximum(h @ w1 + b1, 0.0)
    h = jnp.maximum(h @ w2 + b2, 0.0)
    return h @ w3 + b3


if __name__ == "__main__":
    key = jax.random.PRNGKey(0)
    key, kx1, kx2 = jax.random.split(key, 3)
    params = init_params(key)

    # Small MNIST-like batch: NCHW (B=2, C=1, H=28, W=28) -> 784 flattened
    # features, as required by Linear(784, 8).
    x_small = jax.random.normal(kx1, (2, 1, 28, 28), jnp.float32)
    out_small = jax.block_until_ready(net_forward(x_small, *params))
    ref_small = reference_forward(x_small, *params)
    assert out_small.shape == (2, 10), out_small.shape
    assert jnp.allclose(out_small, ref_small, atol=1e-5, rtol=1e-5), "mismatch (B=2)"

    # Slightly larger, tile-unaligned batch: exercises the multi-step parallel
    # grid and the ragged (masked) last block with no input padding.
    x_ragged = jax.random.normal(kx2, (20, 1, 28, 28), jnp.float32)
    out_ragged = jax.block_until_ready(net_forward(x_ragged, *params))
    ref_ragged = reference_forward(x_ragged, *params)
    assert out_ragged.shape == (20, 10), out_ragged.shape
    assert jnp.allclose(out_ragged, ref_ragged, atol=1e-5, rtol=1e-5), "mismatch (B=20)"

    print("KERNEL_OK")
</pallas_src>

<mosaic_0001>
module attributes {stable_mosaic.version = 11 : i64} {
  func.func @_mlp_kernel(%arg0: i32, %arg1: memref<8x784xf32, #tpu.memory_space<vmem>>, %arg2: memref<784x8xf32, #tpu.memory_space<vmem>>, %arg3: memref<1x8xf32, #tpu.memory_space<vmem>>, %arg4: memref<8x8xf32, #tpu.memory_space<vmem>>, %arg5: memref<1x8xf32, #tpu.memory_space<vmem>>, %arg6: memref<8x10xf32, #tpu.memory_space<vmem>>, %arg7: memref<1x10xf32, #tpu.memory_space<vmem>>, %arg8: memref<8x10xf32, #tpu.memory_space<vmem>>) attributes {dimension_semantics = [#tpu.dimension_semantics<parallel>], iteration_bounds = array<i64: 1>, scalar_prefetch = 0 : i64, scratch_operands = 0 : i64, tpu.core_type = #tpu.core_type<tc>, window_params = [{transform_indices = @transform_0, window_bounds = array<i64: 8, 784>}, {pipeline_mode = #tpu.pipeline_mode<synchronous>, transform_indices = @transform_1, window_bounds = array<i64: 784, 8>}, {pipeline_mode = #tpu.pipeline_mode<synchronous>, transform_indices = @transform_2, window_bounds = array<i64: 1, 8>}, {pipeline_mode = #tpu.pipeline_mode<synchronous>, transform_indices = @transform_3, window_bounds = array<i64: 8, 8>}, {pipeline_mode = #tpu.pipeline_mode<synchronous>, transform_indices = @transform_4, window_bounds = array<i64: 1, 8>}, {pipeline_mode = #tpu.pipeline_mode<synchronous>, transform_indices = @transform_5, window_bounds = array<i64: 8, 10>}, {pipeline_mode = #tpu.pipeline_mode<synchronous>, transform_indices = @transform_6, window_bounds = array<i64: 1, 10>}, {transform_indices = @transform_7, window_bounds = array<i64: 8, 10>}]} {
    %c0 = arith.constant 0 : index
    %c0_0 = arith.constant 0 : index
    %0 = vector.load %arg1[%c0, %c0_0] : memref<8x784xf32, #tpu.memory_space<vmem>>, vector<8x784xf32>
    %c0_1 = arith.constant 0 : index
    %c0_2 = arith.constant 0 : index
    %1 = vector.load %arg2[%c0_1, %c0_2] : memref<784x8xf32, #tpu.memory_space<vmem>>, vector<784x8xf32>
    %cst = arith.constant dense<0.000000e+00> : vector<8x8xf32>
    %2 = tpu.matmul %0, %1, %cst {dimension_numbers = #tpu.dot_dimension_numbers<[1], [0], [0], [1], [0, 0, 1, 1], [], []>} : vector<8x784xf32>, vector<784x8xf32>, vector<8x8xf32> -> vector<8x8xf32>
    %c0_3 = arith.constant 0 : index
    %c0_4 = arith.constant 0 : index
    %3 = vector.load %arg3[%c0_3, %c0_4] : memref<1x8xf32, #tpu.memory_space<vmem>>, vector<1x8xf32>
    %4 = vector.broadcast %3 : vector<1x8xf32> to vector<8x8xf32>
    %5 = arith.addf %2, %4 : vector<8x8xf32>
    %cst_5 = arith.constant 0.000000e+00 : f32
    %6 = vector.broadcast %cst_5 : f32 to vector<8x8xf32>
    %7 = arith.maximumf %5, %6 : vector<8x8xf32>
    %c0_6 = arith.constant 0 : index
    %c0_7 = arith.constant 0 : index
    %8 = vector.load %arg4[%c0_6, %c0_7] : memref<8x8xf32, #tpu.memory_space<vmem>>, vector<8x8xf32>
    %cst_8 = arith.constant dense<0.000000e+00> : vector<8x8xf32>
    %9 = tpu.matmul %7, %8, %cst_8 {dimension_numbers = #tpu.dot_dimension_numbers<[1], [0], [0], [1], [0, 0, 1, 1], [], []>} : vector<8x8xf32>, vector<8x8xf32>, vector<8x8xf32> -> vector<8x8xf32>
    %c0_9 = arith.constant 0 : index
    %c0_10 = arith.constant 0 : index
    %10 = vector.load %arg5[%c0_9, %c0_10] : memref<1x8xf32, #tpu.memory_space<vmem>>, vector<1x8xf32>
    %11 = vector.broadcast %10 : vector<1x8xf32> to vector<8x8xf32>
    %12 = arith.addf %9, %11 : vector<8x8xf32>
    %cst_11 = arith.constant 0.000000e+00 : f32
    %13 = vector.broadcast %cst_11 : f32 to vector<8x8xf32>
    %14 = arith.maximumf %12, %13 : vector<8x8xf32>
    %c0_12 = arith.constant 0 : index
    %c0_13 = arith.constant 0 : index
    %15 = vector.load %arg6[%c0_12, %c0_13] : memref<8x10xf32, #tpu.memory_space<vmem>>, vector<8x10xf32>
    %cst_14 = arith.constant dense<0.000000e+00> : vector<8x10xf32>
    %16 = tpu.matmul %14, %15, %cst_14 {dimension_numbers = #tpu.dot_dimension_numbers<[1], [0], [0], [1], [0, 0, 1, 1], [], []>} : vector<8x8xf32>, vector<8x10xf32>, vector<8x10xf32> -> vector<8x10xf32>
    %c0_15 = arith.constant 0 : index
    %c0_16 = arith.constant 0 : index
    %17 = vector.load %arg7[%c0_15, %c0_16] : memref<1x10xf32, #tpu.memory_space<vmem>>, vector<1x10xf32>
    %18 = vector.broadcast %17 : vector<1x10xf32> to vector<8x10xf32>
    %19 = arith.addf %16, %18 : vector<8x10xf32>
    %c0_17 = arith.constant 0 : index
    %c0_18 = arith.constant 0 : index
    %20 = vector.load %arg8[%c0_17, %c0_18] : memref<8x10xf32, #tpu.memory_space<vmem>>, vector<8x10xf32>
    tpu.vector_store %arg8[%c0_17, %c0_18], %19 {strides = array<i32>} : memref<8x10xf32, #tpu.memory_space<vmem>>, vector<8x10xf32>,
    return
  }
  func.func @transform_0(%arg0: i32) -> (i32, i32) {
    %c0_i32 = arith.constant 0 : i32
    %c0_i32_0 = arith.constant 0 : i32
    return %arg0, %c0_i32 : i32, i32
  }
  func.func @transform_1(%arg0: i32) -> (i32, i32) {
    %c0_i32 = arith.constant 0 : i32
    %c0_i32_0 = arith.constant 0 : i32
    %c0_i32_1 = arith.constant 0 : i32
    return %c0_i32, %c0_i32_0 : i32, i32
  }
  func.func @transform_2(%arg0: i32) -> (i32, i32) {
    %c0_i32 = arith.constant 0 : i32
    %c0_i32_0 = arith.constant 0 : i32
    %c0_i32_1 = arith.constant 0 : i32
    return %c0_i32, %c0_i32_0 : i32, i32
  }
  func.func @transform_3(%arg0: i32) -> (i32, i32) {
    %c0_i32 = arith.constant 0 : i32
    %c0_i32_0 = arith.constant 0 : i32
    %c0_i32_1 = arith.constant 0 : i32
    return %c0_i32, %c0_i32_0 : i32, i32
  }
  func.func @transform_4(%arg0: i32) -> (i32, i32) {
    %c0_i32 = arith.constant 0 : i32
    %c0_i32_0 = arith.constant 0 : i32
    %c0_i32_1 = arith.constant 0 : i32
    return %c0_i32, %c0_i32_0 : i32, i32
  }
  func.func @transform_5(%arg0: i32) -> (i32, i32) {
    %c0_i32 = arith.constant 0 : i32
    %c0_i32_0 = arith.constant 0 : i32
    %c0_i32_1 = arith.constant 0 : i32
    return %c0_i32, %c0_i32_0 : i32, i32
  }
  func.func @transform_6(%arg0: i32) -> (i32, i32) {
    %c0_i32 = arith.constant 0 : i32
    %c0_i32_0 = arith.constant 0 : i32
    %c0_i32_1 = arith.constant 0 : i32
    return %c0_i32, %c0_i32_0 : i32, i32
  }
  func.func @transform_7(%arg0: i32) -> (i32, i32) {
    %c0_i32 = arith.constant 0 : i32
    %c0_i32_0 = arith.constant 0 : i32
    return %arg0, %c0_i32 : i32, i32
  }
}

</mosaic_0001>

<bundles_post_ra>
// kernel: net_forward.1
= control target key start
LH: loop header
LB: loop body
LE: loop exit
PB: predicated region body
PF: predicated region fallthrough
CT: control target
= control target key end

     0   :  { %12 = vsyncpa [#allocation3], 0  ;;  %v968_v51 = vmov 1983009808   ;;  %v155_v53 = vlaneseq  ;;  %vm970_vm0 = vmmov 0   ;;  %vm225_vm1 = vcmask 130048   ;;  %s1378_s0 = inlined_call_operand.vmem [shape: f32[2,784], index: 0, kind: input, shape index: {}]   ;;  %s1379_s1 = inlined_call_operand.vmem [shape: f32[784,8], index: 1, kind: input, shape index: {}]   ;;  %s1380_s2 = inlined_call_operand.vmem [shape: f32[1,8], index: 2, kind: input, shape index: {}]   ;;  %s1381_s3 = inlined_call_operand.vmem [shape: f32[8,8], index: 3, kind: input, shape index: {}]   ;;  %s1382_s4 = inlined_call_operand.vmem [shape: f32[1,8], index: 4, kind: input, shape index: {}]   ;;  %s1383_s5 = inlined_call_operand.vmem [shape: f32[8,10], index: 5, kind: input, shape index: {}]   ;;  %s1384_s6 = inlined_call_operand.vmem [shape: f32[1,10], index: 6, kind: input, shape index: {}]   ;;  %s1385_s7 = inlined_call_operand.hbm [shape: f32[2,10], index: 7, kind: output, shape index: {}]  }
   0x1   :  { %v51_v0 = vld [vmem:[%s1379_s1 + $0x80] sm:$0xff]  ;;  %v52_v1 = vld [vmem:[%s1379_s1 + $0x88] sm:$0xff]  ;;  %v53_v12 = vld [vmem:[%s1379_s1 + $0x90] sm:$0xff]  ;;  %v153_v52 = vunpack.c.l.s4 %v968_v51  ;;  %vm517_vm2 = vcmask 64512   ;;  %vm673_vm3 = vcmask 80896  }
   0x2   :  { %v826_v2 = vpack.c.bf16 %v52_v1, %v51_v0  ;;  %v35_v3 = vld [vmem:[%s1379_s1] sm:$0xff]  ;;  %v36_v4 = vld [vmem:[%s1379_s1 + $0x8] sm:$0xff]  ;;  %v54_v13 = vld [vmem:[%s1379_s1 + $0x98] sm:$0xff] }
   0x3   :  { %v83_v5 = vld [vmem:[%s1379_s1 + $0x180] sm:$0xff]  ;;  %v828_v6 = vpack.c.bf16 %v36_v4, %v35_v3  ;;  %v84_v7 = vld [vmem:[%s1379_s1 + $0x188] sm:$0xff]  ;;  %v37_v14 = vld [vmem:[%s1379_s1 + $0x10] sm:$0xff]  ;;  %v830_v15 = vpack.c.bf16 %v54_v13, %v53_v12  ;;  %v156_v3 = vshrl.u32 %v155_v53, 7 }
   0x4   :  { %v67_v8 = vld [vmem:[%s1379_s1 + $0x100] sm:$0xff]  ;;  %v68_v9 = vld [vmem:[%s1379_s1 + $0x108] sm:$0xff]  ;;  %827 = vmatprep.subr.bf16.mxu0 %v826_v2  ;;  %v858_v10 = vpack.c.bf16 %v84_v7, %v83_v5  ;;  %v38_v16 = vld [vmem:[%s1379_s1 + $0x18] sm:$0xff]  ;;  %v154_v2 = vunpack.c.0.s8 %v153_v52 }
   0x5   :  { %v860_v11 = vpack.c.bf16 %v68_v9, %v67_v8  ;;  %829 = vmatpush3.bf16.msra.mxu0 %v828_v6  ;;  %v85_v17 = vld [vmem:[%s1379_s1 + $0x190] sm:$0xff]  ;;  %v86_v18 = vld [vmem:[%s1379_s1 + $0x198] sm:$0xff]  ;;  %v832_v19 = vpack.c.bf16 %v38_v16, %v37_v14  ;;  %v55_v23 = vld [vmem:[%s1379_s1 + $0xa0] sm:$0xff] }
   0x6   :  { %859 = vmatprep.subr.bf16.mxu1 %v858_v10  ;;  %v862_v20 = vpack.c.bf16 %v86_v18, %v85_v17  ;;  %v69_v21 = vld [vmem:[%s1379_s1 + $0x110] sm:$0xff]  ;;  %v70_v22 = vld [vmem:[%s1379_s1 + $0x118] sm:$0xff]  ;;  %831 = vmatprep.subr.bf16.mxu0 %v830_v15  ;;  %v56_v25 = vld [vmem:[%s1379_s1 + $0xa8] sm:$0xff] }
   0x7   :  { %861 = vmatpush3.bf16.msra.mxu1 %v860_v11  ;;  %v864_v24 = vpack.c.bf16 %v70_v22, %v69_v21  ;;  %v39_v26 = vld [vmem:[%s1379_s1 + $0x20] sm:$0xff]  ;;  %v40_v27 = vld [vmem:[%s1379_s1 + $0x28] sm:$0xff]  ;;  %v834_v28 = vpack.c.bf16 %v56_v25, %v55_v23  ;;  %v57_v35 = vld [vmem:[%s1379_s1 + $0xb0] sm:$0xff] }
   0x8   :  { %863 = vmatprep.subr.bf16.mxu1 %v862_v20  ;;  %v87_v29 = vld [vmem:[%s1379_s1 + $0x1a0] sm:$0xff]  ;;  %v88_v30 = vld [vmem:[%s1379_s1 + $0x1a8] sm:$0xff]  ;;  %v836_v32 = vpack.c.bf16 %v40_v27, %v39_v26  ;;  %v58_v36 = vld [vmem:[%s1379_s1 + $0xb8] sm:$0xff]  ;;  %v1183_v20 = vsub.s32 %v154_v2, %v156_v3 }
   0x9   :  { %v71_v31 = vld [vmem:[%s1379_s1 + $0x120] sm:$0xff]  ;;  %833 = vmatpush3.bf16.msra.mxu0 %v832_v19  ;;  %v866_v33 = vpack.c.bf16 %v88_v30, %v87_v29  ;;  %v72_v34 = vld [vmem:[%s1379_s1 + $0x128] sm:$0xff]  ;;  %v838_v37 = vpack.c.bf16 %v58_v36, %v57_v35  ;;  %v41_v38 = vld [vmem:[%s1379_s1 + $0x30] sm:$0xff] }
   0xa   :  { %835 = vmatprep.subr.bf16.mxu0 %v834_v28  ;;  %v42_v39 = vld [vmem:[%s1379_s1 + $0x38] sm:$0xff]  ;;  %v89_v40 = vld [vmem:[%s1379_s1 + $0x1b0] sm:$0xff]  ;;  %v868_v41 = vpack.c.bf16 %v72_v34, %v71_v31  ;;  %v59_v46 = vld [vmem:[%s1379_s1 + $0xc0] sm:$0xff] }
   0xb   :  { %865 = vmatpush3.bf16.msra.mxu1 %v864_v24  ;;  %v90_v42 = vld [vmem:[%s1379_s1 + $0x1b8] sm:$0xff]  ;;  %v73_v43 = vld [vmem:[%s1379_s1 + $0x130] sm:$0xff]  ;;  %v60_v47 = vld [vmem:[%s1379_s1 + $0xc8] sm:$0xff]  ;;  %v840_v48 = vpack.c.bf16 %v42_v39, %v41_v38 }
   0xc   :  { %867 = vmatprep.subr.bf16.mxu1 %v866_v33  ;;  %v870_v44 = vpack.c.bf16 %v90_v42, %v89_v40  ;;  %v74_v45 = vld [vmem:[%s1379_s1 + $0x138] sm:$0xff]  ;;  %v91_v49 = vld [vmem:[%s1379_s1 + $0x1c0] sm:$0xff]  ;;  %v92_v50 = vld [vmem:[%s1379_s1 + $0x1c8] sm:$0xff]  ;;  %v842_v54 = vpack.c.bf16 %v60_v47, %v59_v46 }
   0xd   :  { %837 = vmatpush3.bf16.msra.mxu0 %v836_v32  ;;  %v43_v55 = vld [vmem:[%s1379_s1 + $0x40] sm:$0xff]  ;;  %v44_v56 = vld [vmem:[%s1379_s1 + $0x48] sm:$0xff]  ;;  %v872_v57 = vpack.c.bf16 %v74_v45, %v73_v43  ;;  %v61_v58 = vld [vmem:[%s1379_s1 + $0xd0] sm:$0xff]  ;;  %v874_v60 = vpack.c.bf16 %v92_v50, %v91_v49 }
   0xe   :  { %839 = vmatprep.subr.bf16.mxu0 %v838_v37  ;;  %v62_v59 = vld [vmem:[%s1379_s1 + $0xd8] sm:$0xff]  ;;  %v75_v61 = vld [vmem:[%s1379_s1 + $0x140] sm:$0xff]  ;;  %v76_v62 = vld [vmem:[%s1379_s1 + $0x148] sm:$0xff]  ;;  %v844_v63 = vpack.c.bf16 %v44_v56, %v43_v55 }
   0xf   :  { %869 = vmatpush3.bf16.msra.mxu1 %v868_v41  ;;  %v93_v0 = vld [vmem:[%s1379_s1 + $0x1d0] sm:$0xff]  ;;  %v94_v1 = vld [vmem:[%s1379_s1 + $0x1d8] sm:$0xff]  ;;  %v846_v4 = vpack.c.bf16 %v62_v59, %v61_v58  ;;  %v876_v8 = vpack.c.bf16 %v76_v62, %v75_v61  ;;  %v63_v10 = vld [vmem:[%s1379_s1 + $0xe0] sm:$0xff] }
  0x10   :  { %871 = vmatprep.subr.bf16.mxu1 %v870_v44  ;;  %v45_v5 = vld [vmem:[%s1379_s1 + $0x50] sm:$0xff]  ;;  %v46_v6 = vld [vmem:[%s1379_s1 + $0x58] sm:$0xff]  ;;  %v64_v11 = vld [vmem:[%s1379_s1 + $0xe8] sm:$0xff]  ;;  %v878_v12 = vpack.c.bf16 %v94_v1, %v93_v0  ;;  %v969_v1 = vmov 0.0|0.0  }
  0x11   :  { %841 = vmatpush3.bf16.msra.mxu0 %v840_v48  ;;  %v77_v7 = vld [vmem:[%s1379_s1 + $0x150] sm:$0xff]  ;;  %v78_v9 = vld [vmem:[%s1379_s1 + $0x158] sm:$0xff]  ;;  %v47_v13 = vld [vmem:[%s1379_s1 + $0x60] sm:$0xff]  ;;  %v848_v16 = vpack.c.bf16 %v46_v6, %v45_v5  ;;  %v850_v21 = vpack.c.bf16 %v64_v11, %v63_v10 }
  0x12   :  { %843 = vmatprep.subr.bf16.mxu0 %v842_v54  ;;  %v48_v14 = vld [vmem:[%s1379_s1 + $0x68] sm:$0xff]  ;;  %v95_v15 = vld [vmem:[%s1379_s1 + $0x1e0] sm:$0xff]  ;;  %v65_v18 = vld [vmem:[%s1379_s1 + $0xf0] sm:$0xff]  ;;  %v880_v22 = vpack.c.bf16 %v78_v9, %v77_v7 }
  0x13   :  { %873 = vmatpush3.bf16.msra.mxu1 %v872_v57  ;;  %v96_v17 = vld [vmem:[%s1379_s1 + $0x1e8] sm:$0xff]  ;;  %v66_v19 = vld [vmem:[%s1379_s1 + $0xf8] sm:$0xff]  ;;  %v79_v26 = vld [vmem:[%s1379_s1 + $0x160] sm:$0xff]  ;;  %v852_v29 = vpack.c.bf16 %v48_v14, %v47_v13  ;;  %v971_v14 = vmov 0.0  }
  0x14   :  { %875 = vmatprep.subr.bf16.mxu1 %v874_v60  ;;  %v932_v23 = vld [vmem:[%s1378_s0] ss:$14 sps:$4 sm:$0xff]   ;;  %v934_v24 = vld [vmem:[%s1378_s0 + $0x1c] ss:$14 sps:$4 sm:$0xff]   ;;  %v882_v25 = vpack.c.bf16 %v96_v17, %v95_v15  ;;  %v936_v33 = vld [vmem:[%s1378_s0 + $0x4] ss:$14 sps:$4 sm:$0xff]   ;;  %v854_v35 = vpack.c.bf16 %v66_v19, %v65_v18 }
  0x15   :  { %845 = vmatpush3.bf16.msra.mxu0 %v844_v63  ;;  %v80_v27 = vld [vmem:[%s1379_s1 + $0x168] sm:$0xff]  ;;  %v97_v28 = vld [vmem:[%s1379_s1 + $0x1f0] sm:$0xff]  ;;  %v98_v30 = vld [vmem:[%s1379_s1 + $0x1f8] sm:$0xff]  ;;  %v158_v31 = vrot.slane %v932_v23, %v1183_v20  ;;  %v172_v32 = vrot.slane %v934_v24, %v1183_v20  ;;  %v165_v42 = vrot.slane %v936_v33, %v1183_v20 }
  0x16   :  { %847 = vmatprep.subr.bf16.mxu0 %v846_v4  ;;  %v937_v34 = vld [vmem:[%s1378_s0 + $0x20] ss:$14 sps:$4 sm:$0xff]   ;;  %v50_v37 = vld [vmem:[%s1379_s1 + $0x78] sm:$0xff]  ;;  %v884_v38 = vpack.c.bf16 %v80_v27, %v79_v26  ;;  %v886_v44 = vpack.c.bf16 %v98_v30, %v97_v28  ;;  %v941_v5 = vld [vmem:[%s1378_s0 + $0x24] ss:$14 sps:$4 sm:$0xff]  }
  0x17   :  { %877 = vmatpush3.bf16.msra.mxu1 %v876_v8  ;;  %v49_v36 = vld [vmem:[%s1379_s1 + $0x70] sm:$0xff]  ;;  %v181_v39 = vcombine.high %v158_v31, %v172_v32  ;;  %v115_v40 = vld [vmem:[%s1379_s1 + $0x280] sm:$0xff]  ;;  %v116_v41 = vld [vmem:[%s1379_s1 + $0x288] sm:$0xff]  ;;  %v179_v43 = vrot.slane %v937_v34, %v1183_v20  ;;  %v180_v55 = vcombine.low %v158_v31, %v172_v32  ;;  %v208_v11 = vrot.slane %v941_v5, %v1183_v20 }
  0x18   :  { %879 = vmatprep.subr.bf16.mxu1 %v878_v12  ;;  %v81_v45 = vld [vmem:[%s1379_s1 + $0x170] sm:$0xff]  ;;  %v82_v46 = vld [vmem:[%s1379_s1 + $0x178] sm:$0xff]  ;;  %v856_v47 = vpack.c.bf16 %v50_v37, %v49_v36  ;;  %v890_v49 = vpack.c.bf16 %v116_v41, %v115_v40  ;;  %v99_v50 = vld [vmem:[%s1379_s1 + $0x200] sm:$0xff] }
  0x19   :  { %849 = vmatpush3.bf16.msra.mxu0 %v848_v16  ;;  %292 = vmatprep.mubr.f32.mxu0 %v181_v39  ;;  %v183_v48 = vcombine.high %v165_v42, %v179_v43  ;;  %v100_v51 = vld [vmem:[%s1379_s1 + $0x208] sm:$0xff]  ;;  %v888_v52 = vpack.c.bf16 %v82_v46, %v81_v45  ;;  %v117_v53 = vld [vmem:[%s1379_s1 + $0x290] sm:$0xff]  ;;  %v118_v54 = vld [vmem:[%s1379_s1 + $0x298] sm:$0xff]  ;;  %v182_v57 = vcombine.low %v165_v42, %v179_v43 }
  0x1a   :  { %851 = vmatprep.subr.bf16.mxu0 %v850_v21  ;;  %v892_v56 = vpack.c.bf16 %v100_v51, %v99_v50  ;;  %v894_v58 = vpack.c.bf16 %v118_v54, %v117_v53  ;;  %v101_v59 = vld [vmem:[%s1379_s1 + $0x210] sm:$0xff]  ;;  %v102_v60 = vld [vmem:[%s1379_s1 + $0x218] sm:$0xff]  ;;  %v119_v61 = vld [vmem:[%s1379_s1 + $0x2a0] sm:$0xff] }
  0x1b   :  { %881 = vmatpush3.bf16.msra.mxu1 %v880_v22  ;;  %362 = vmatprep.mubr.f32.mxu1 %v183_v48  ;;  %v120_v62 = vld [vmem:[%s1379_s1 + $0x2a8] sm:$0xff]  ;;  %v103_v63 = vld [vmem:[%s1379_s1 + $0x220] sm:$0xff]  ;;  %v896_v2 = vpack.c.bf16 %v102_v60, %v101_v59  ;;  %v121_v3 = vld [vmem:[%s1379_s1 + $0x2b0] sm:$0xff] }
  0x1c   :  { %883 = vmatprep.subr.bf16.mxu1 %v882_v25  ;;  %v104_v0 = vld [vmem:[%s1379_s1 + $0x228] sm:$0xff]  ;;  %v898_v6 = vpack.c.bf16 %v120_v62, %v119_v61  ;;  %v122_v9 = vld [vmem:[%s1379_s1 + $0x2b8] sm:$0xff]  ;;  %v131_v12 = vld [vmem:[%s1379_s1 + $0x300] sm:$0xff] }
  0x1d   :  { %853 = vmatpush3.bf16.msra.mxu0 %v852_v29  ;;  %v938_v4 = vld [vmem:[%s1378_s0 + $0x8] ss:$14 sps:$4 sm:$0xff]   ;;  %v940_v7 = vld [vmem:[%s1378_s0 + $0xc] ss:$14 sps:$4 sm:$0x33]   ;;  %v900_v18 = vpack.c.bf16 %v104_v0, %v103_v63  ;;  %v902_v21 = vpack.c.bf16 %v122_v9, %v121_v3  ;;  %v107_v28 = vld [vmem:[%s1379_s1 + $0x240] sm:$0xff] }
  0x1e   :  { %855 = vmatprep.subr.bf16.mxu0 %v854_v35  ;;  %v943_v8 = vld [vmem:[%s1378_s0 + $0x28] ss:$14 sps:$4 sm:$0x33]   ;;  %v194_v10 = vrot.slane %v938_v4, %v1183_v20  ;;  %v201_v15 = vrot.slane %v940_v7, %v1183_v20  ;;  %v106_v23 = vld [vmem:[%s1379_s1 + $0x238] sm:$0xff]  ;;  %v127_v36 = vld [vmem:[%s1379_s1 + $0x2e0] sm:$0xff] }
  0x1f   :  { %885 = vmatpush3.bf16.msra.mxu1 %v884_v38  ;;  %v132_v13 = vld [vmem:[%s1379_s1 + $0x308] sm:$0xff]  ;;  %v215_v16 = vrot.slane %v943_v8, %v1183_v20  ;;  %v105_v22 = vld [vmem:[%s1379_s1 + $0x230] sm:$0xff]  ;;  %v123_v20 = vld [vmem:[%s1379_s1 + $0x2c0] sm:$0xff] }
  0x20   :  { %887 = vmatprep.subr.bf16.mxu1 %v886_v44  ;;  %v923_v17 = vpack.c.bf16 %v132_v13, %v131_v12  ;;  %v217_v19 = vcombine.high %v194_v10, %v208_v11  ;;  %v124_v25 = vld [vmem:[%s1379_s1 + $0x2c8] sm:$0xff]  ;;  %v904_v26 = vpack.c.bf16 %v106_v23, %v105_v22  ;;  %v125_v30 = vld [vmem:[%s1379_s1 + $0x2d0] sm:$0xff]  ;;  %v126_v31 = vld [vmem:[%s1379_s1 + $0x2d8] sm:$0xff] }
  0x21   :  { %857 = vmatpush3.bf16.msra.mxu0 %v856_v47  ;;  %v218_v24 = vcombine.low %v201_v15, %v215_v16  ;;  %v906_v27 = vpack.c.bf16 %v124_v25, %v123_v20  ;;  %v108_v29 = vld [vmem:[%s1379_s1 + $0x248] sm:$0xff]  ;;  %v910_v33 = vpack.c.bf16 %v126_v31, %v125_v30  ;;  %v109_v34 = vld [vmem:[%s1379_s1 + $0x250] sm:$0xff]  ;;  %v110_v35 = vld [vmem:[%s1379_s1 + $0x258] sm:$0xff] }
  0x22   :  { %891 = vmatprep.subr.bf16.mxu0 %v890_v49  ;;  %v908_v32 = vpack.c.bf16 %v108_v29, %v107_v28  ;;  %v128_v37 = vld [vmem:[%s1379_s1 + $0x2e8] sm:$0xff]  ;;  %v912_v38 = vpack.c.bf16 %v110_v35, %v109_v34  ;;  %v111_v40 = vld [vmem:[%s1379_s1 + $0x260] sm:$0xff]  ;;  %v129_v42 = vld [vmem:[%s1379_s1 + $0x2f0] sm:$0xff]  ;;  %v216_v49 = vcombine.low %v194_v10, %v208_v11 }
  0x23   :  { %889 = vmatpush3.bf16.msra.mxu1 %v888_v52  ;;  %v914_v39 = vpack.c.bf16 %v128_v37, %v127_v36  ;;  %v112_v41 = vld [vmem:[%s1379_s1 + $0x268] sm:$0xff]  ;;  %v130_v43 = vld [vmem:[%s1379_s1 + $0x2f8] sm:$0xff]  ;;  %v113_v46 = vld [vmem:[%s1379_s1 + $0x270] sm:$0xff] }
  0x24   :  { %293 = vmatmul.mubr.f32.vlgmr.msra.gmra.mrb[0].mxu0 %v180_v55  ;;  %922 = vmatprep.subr.bf16.mxu1 %v969_v1  ;;  %v916_v44 = vpack.c.bf16 %v112_v41, %v111_v40  ;;  %v918_v45 = vpack.c.bf16 %v130_v43, %v129_v42  ;;  %v114_v47 = vld [vmem:[%s1379_s1 + $0x278] sm:$0xff]  ;;  %v509_v50 = vld [vmem:[%s1381_s3] sm:$0xff] }
  0x25   :  { %893 = vmatpush3.bf16.msra.mxu0 %v892_v56  ;;  %432 = vmatprep.mubr.f32.mxu0 %v217_v19  ;;  %v920_v48 = vpack.c.bf16 %v114_v47, %v113_v46  ;;  %v691_v52 = vld [vmem:[%s1380_s2] ss:$0 sm:$0xff] }
  0x26   :  { %363 = vmatmul.mubr.f32.vlgmr.msra.gmra.mrb[0].mxu1 %v182_v57  ;;  %895 = vmatprep.subr.bf16.mxu0 %v894_v58  ;;  %v592_v4 = vld [vmem:[%s1383_s5] sm:$0xff] }
  0x27   :  { %813 = vmatprep.mubr.msk.f32.mxu1 %vm970_vm0, %v971_v14  ;;  %924 = vmatpush3.bf16.msra.mxu1 %v923_v17  ;;  %v693_v5 = vld [vmem:[%s1382_s4] ss:$0 sm:$0xff] }
  0x28   :  { %816 = vmatprep.subr.mxu1 %v971_v14  ;;  %v695_v10 = vld [vmem:[%s1384_s6] ss:$0 sm:$0xff] }
  0x29   :  { %897 = vmatpush3.bf16.msra.mxu0 %v896_v2 }
  0x2a   :  { %899 = vmatprep.subr.bf16.mxu0 %v898_v6  ;;  %814 = vmatmul.mubr.msk.f32.vlgmr.msra.gmra.mrb[2].mxu1 %vm225_vm1, %v218_v24 }
  0x2b   :  { %818 = vmatprep.mubr.msk.f32.mxu1 %vm970_vm0, %v971_v14  ;;  %817 = vmatpush3.msra.mxu1 %v509_v50 }
  0x2c   :  { %821 = vmatprep.subr.mxu1 %v971_v14 }
  0x2d   :  { %901 = vmatpush3.bf16.msra.mxu0 %v900_v18 }
  0x2e   :  { %903 = vmatprep.subr.bf16.mxu0 %v902_v21 }
  0x31   :  { %905 = vmatpush3.bf16.msra.mxu0 %v904_v26 }
  0x32   :  { %907 = vmatprep.subr.bf16.mxu0 %v906_v27 }
  0x35   :  { %909 = vmatpush3.bf16.msra.mxu0 %v908_v32 }
  0x36   :  { %911 = vmatprep.subr.bf16.mxu0 %v910_v33 }
  0x39   :  { %913 = vmatpush3.bf16.msra.mxu0 %v912_v38 }
  0x3a   :  { %915 = vmatprep.subr.bf16.mxu0 %v914_v39 }
  0x3d   :  { %917 = vmatpush3.bf16.msra.mxu0 %v916_v44 }
  0x3e   :  { %919 = vmatprep.subr.bf16.mxu0 %v918_v45 }
  0x41   :  { %921 = vmatpush3.bf16.msra.mxu0 %v920_v48 }
  0x44   :  { %433 = vmatmul.mubr.f32.vlgmr.msra.gmra.mrb[2].mxu0 %v216_v49 }
  0xf7   :  { %v729_v51 = vpop.f32.mrb[0].mxu0 }
  0xf8   :  { %v730_v53 = vpop.f32.mrb[1].mxu0 }
  0xf9   :  { %v731_v54 = vadd.f32 %v730_v53, %v729_v51  ;;  %v764_v55 = vpop.f32.mrb[0].mxu1 }
  0xfa   :  { %v765_v56 = vpop.f32.mrb[1].mxu1 }
  0xfb   :  { %v295_v57 = vadd.f32 %v731_v54, %v691_v52  ;;  %v766_v58 = vadd.f32 %v765_v56, %v764_v55 }
  0xfd   :  { %v365_v59 = vadd.f32 %v766_v58, %v295_v57  ;;  %v504_v60 = vpop.f32.mrb[2].mxu1 }
  0xfe   :  { %v815_v61 = vpop.f32.mrb[3].mxu1 }
 0x117   :  { %v799_v62 = vpop.f32.mrb[2].mxu0 }
 0x118   :  { %v800_v63 = vpop.f32.mrb[3].mxu0 }
 0x119   :  { %v801_v0 = vadd.f32 %v800_v63, %v799_v62 }
 0x11b   :  { %v435_v1 = vadd.f32 %v801_v0, %v365_v59 }
 0x11d   :  { %v505_v2 = vadd.f32 %v504_v60, %v435_v1 }
 0x11f   :  { %v508_v3 = vmax.f32 %v505_v2, 0.0 }
 0x121   :  { %819 = vmatmul.mubr.msk.f32.vlgmr.msra.gmra.mrb[4].mxu1 %vm517_vm2, %v508_v3 }
 0x122   :  { %823 = vmatprep.mubr.msk.f32.mxu1 %vm970_vm0, %v971_v14  ;;  %822 = vmatpush3.msra.mxu1 %v592_v4 }
 0x1f4   :  { %v587_v6 = vpop.f32.mrb[4].mxu1 }
 0x1f5   :  { %v588_v7 = vadd.f32 %v693_v5, %v587_v6  ;;  %v820_v8 = vpop.f32.mrb[5].mxu1 }
 0x1f7   :  { %v591_v9 = vmax.f32 %v588_v7, 0.0 }
 0x1f9   :  { %824 = vmatmul.mubr.msk.f32.vlgmr.msra.gmra.mrb[6].mxu1 %vm517_vm2, %v591_v9 }
 0x2cc   :  { %v669_v11 = vpop.f32.mrb[6].mxu1 }
 0x2cd   :  { %v670_v12 = vadd.f32 %v695_v10, %v669_v11  ;;  %v825_v13 = vpop.f32.mrb[7].mxu1 }
 0x2cf   :  { %674 = vst.msk [vmem:[#allocation2] sm:$0xff] %vm673_vm3, %v670_v12 }
 0x2d0   :  { %679 = vsyncadd [#allocation3], 96  ;;  %s972_s5 = smov [#allocation2]  }
 0x2d1   :  { %s680_s11 = sshll.u32 %s972_s5, 4  ;;  %s681_s11 = int_to_ptr.vmem [resolvable:$true] %s680_s11 }
 0x2d2   :  { %s944_s12 = scalar_lea.vmem %s681_s11, 32  ;;  %s948_s4 = scalar_lea.vmem %s681_s11, 128 }
 0x2d3   :  { %p945_p0 = scmp.ne.s32.totalorder %s681_s11, %s944_s12  ;;  %p949_p1 = scmp.lt.s32.totalorder %s681_s11, %s681_s11 }
 0x2d4   :  { %p950_p2 = scmp.lt.s32.totalorder %s948_s4, %s944_s12 }
 0x2d6   :  { %p951_p3 = por %p950_p2, %p949_p1 }
 0x2d8   :  { %p952_p4 = pnand %p951_p3, %p945_p0 }
 0x2da   :  { %955 = shalt.err (!%p952_p4)
}
 0x2db   :  { %s956_s6 = scalar_lea.hbm %s1385_s7, 32 }
 0x2dc   :  { %p957_p5 = scmp.ne.s32.totalorder %s1385_s7, %s956_s6  ;;  %p960_p6 = scmp.lt.u32.totalorder %s956_s6, %s1385_s7 }
 0x2de   :  { %p962_p7 = pnand %p960_p6, %p957_p5 }
 0x2e0   :  { %965 = shalt.err (!%p962_p7)
}
 0x2e1   :  { %s973_s18 = smov 32   ;;  %s974_s19 = smov 2  }
 0x2e2   :  { %686 = dma.vmem_to_hbm [thread:$0]  %s681_s11, 32, %s1385_s7, [#allocation3], %s973_s18, %s973_s18, %s974_s19  }
 0x2e3   :  { %966 = dma.done.wait [#allocation3], 128  }
 0x2e4   :  { %967 = vsyncadd [#allocation3], 4294967168 }
 0x2e5   :  { %690 = vsyncpa [#allocation3], 1 }

</bundles_post_ra>
